<compile_context>
chip_gen: v7x
topology: tpu7x:2x2x1
jax: 0.10.0
libtpu: 0.0.40
codegen_flags: <defaults>
</compile_context>

<pallas_src>
import functools

import jax
import jax.numpy as jnp
from jax.experimental import pallas as pl
from jax.experimental.pallas import tpu as pltpu


# ----------------------------- kernels ------------------------------------- #

def _attn_kernel_per_batch(k_ref, v_ref, vl_ref, wkv_ref, o_ref, *, approx_recip):
    """valid_lens is per-batch (or None): the attention row is the same for every
    query, so softmax and the bmm collapse to one row / one matvec per batch."""
    f32 = jnp.float32
    k = k_ref[...]                                         # (Bt, K, Dk) stream dtype
    v = v_ref[...]                                         # (Bt, K, Dv)
    bt = k.shape[0]
    vl = vl_ref[...].reshape(bt, 1)                        # (Bt, 1) int32
    wkv = wkv_ref[...].astype(f32)                         # (1, Dk) = W_k @ w_v

    # s_k[b,k] = k . (W_k w_v): VPU multiply + lane reduce; no (Q,K,H) tensor.
    s_k = jnp.sum(k.astype(f32) * wkv, axis=-1)            # (Bt, K)

    # MaskedSoftmax over keys (value -1e6), done once per batch row.
    col = jax.lax.broadcasted_iota(jnp.int32, (1, s_k.shape[1]), 1)   # (1, K)
    s_k = jnp.where(col < vl, s_k, jnp.float32(-1000000.0))
    m = jnp.max(s_k, axis=-1, keepdims=True)
    e = jnp.exp(s_k - m)                                   # EUP work: Bt*K only
    denom = jnp.sum(e, axis=-1, keepdims=True)             # >= 1 (row max -> exp(0))
    attn = e * pl.reciprocal(denom, approx=approx_recip)   # (Bt, K)

    # torch.bmm(attn, values): one (1,K)x(K,Dv) matvec per batch, f32 accumulate,
    # then broadcast over the Q tile for the store.
    out = jnp.einsum("bqk,bkd->bqd", attn[:, None, :].astype(v.dtype), v,
                     preferred_element_type=jnp.float32)   # (Bt, 1, Dv)
    o_ref[...] = jnp.broadcast_to(out, o_ref.shape).astype(o_ref.dtype)


def _attn_kernel_per_query(k_ref, v_ref, vl_ref, wkv_ref, o_ref, *, approx_recip):
    """valid_lens is 2-D (per-query lengths): general masked-softmax path."""
    f32 = jnp.float32
    k = k_ref[...]                                         # (Bt, K, Dk)
    v = v_ref[...]                                         # (Bt, K, Dv)
    vl = vl_ref[...]                                       # (Bt, Qt, 1) int32
    wkv = wkv_ref[...].astype(f32)                         # (1, Dk)

    s_k = jnp.sum(k.astype(f32) * wkv, axis=-1)            # (Bt, K)
    # Mask iota kept at (1,1,K); compare broadcasts (no (Bt,Qt,K) int32 tensor).
    col = jax.lax.broadcasted_iota(jnp.int32, (1, 1, s_k.shape[1]), 2)
    scores = jnp.where(col < vl, s_k[:, None, :], jnp.float32(-1000000.0))  # (Bt,Qt,K)
    m = jnp.max(scores, axis=-1, keepdims=True)
    e = jnp.exp(scores - m)
    denom = jnp.sum(e, axis=-1, keepdims=True)
    attn = e * pl.reciprocal(denom, approx=approx_recip)

    out = jnp.einsum("bqk,bkd->bqd", attn.astype(v.dtype), v,
                     preferred_element_type=jnp.float32)
    o_ref[...] = out.astype(o_ref.dtype)


# --------------------------- tiling / wrapper ------------------------------- #

def _vmem_capacity_and_cores():
    """Generation-aware VMEM capacity (bytes) and TensorCore count, with safe
    fallbacks (64 MiB = v7x-conservative, 1 core)."""
    cap = 64 * 1024 * 1024
    cores = 1
    try:
        info = pltpu.get_tpu_info()
        cap = int(getattr(info, "vmem_capacity_bytes", cap)) or cap
        for attr in ("num_cores", "tensorcores_per_chip", "core_count"):
            val = getattr(info, attr, None)
            if val:
                cores = int(val)
                break
    except Exception:
        pass
    try:
        val = getattr(jax.devices()[0], "num_cores", None)
        if val:
            cores = max(cores, int(val))
    except Exception:
        pass
    return cap, cores


def _choose_blocks(B, Q, K, Dk, Dv, in_itemsize, out_itemsize, per_query_lens,
                   vmem_budget_bytes, num_cores):
    """Largest (Bt, Qt) block that fits the budget; fail loudly if nothing fits."""
    def step_bytes(bt, qt):
        io = bt * K * (Dk + Dv) * in_itemsize              # keys + values block
        io += bt * qt * Dv * out_itemsize                  # output block
        pad_q = qt if per_query_lens else 1
        io += bt * max(pad_q, 8) * 128 * 4                 # valid_lens, (8,128)-padded
        io += 8 * max(Dk, 128) * 4                         # fused weight row
        io *= 2                                            # double-buffered pipeline
        tmp = 3 * bt * K * 4 + bt * qt * Dv * 4            # s_k/e/attn + f32 out
        if per_query_lens:
            tmp += 3 * bt * qt * K * 4                     # (Bt,Qt,K) scores/e/attn
        return io + tmp

    b_divs = [d for d in range(1, B + 1) if B % d == 0]
    # Qt must be the full Q or a multiple of 16 (sublane-safe for f32/bf16/int32).
    q_divs = [Q] + sorted({d for d in range(16, Q, 16) if Q % d == 0}, reverse=True)

    choice = None
    for qt in q_divs:
        for bt in sorted(b_divs, reverse=True):
            if step_bytes(bt, qt) <= vmem_budget_bytes:
                choice = (bt, qt)
                break
        if choice is not None:
            break
    if choice is None:
        raise ValueError(
            "AdditiveAttention Pallas kernel: even a single-batch / minimal-Q block "
            f"exceeds the {vmem_budget_bytes / 2**20:.1f} MiB VMEM budget "
            f"(B={B}, Q={Q}, K={K}, Dk={Dk}, Dv={Dv}); shrink the sequence lengths "
            "or pre-split the batch.")
    bt, qt = choice

    # Give every TensorCore at least one grid step (v7x megacore); on 1-TC chips
    # (v5e/v6e) no shrink is applied, keeping the largest possible tile.
    if num_cores >= 2:
        while (B // bt) * (Q // qt) < num_cores and bt > 1:
            bt = max(d for d in b_divs if d < bt)
    return bt, qt


def additive_attention(queries, keys, values, valid_lens, W_q, W_k, w_v, *,
                       compute_dtype=None, block_b=None, block_q=None,
                       approx_recip=True):
    """Pallas forward of AdditiveAttention.  queries/W_q only define Q; they cancel
    out of the softmax exactly (no tanh in the reference forward) and are never
    streamed.  compute_dtype controls the keys/values stream + MXU operand dtype
    (e.g. jnp.bfloat16 on v6e/v7x halves HBM bytes); score math stays f32."""
    B, Q, _ = queries.shape
    _, K, Dk = keys.shape
    _, _, Dv = values.shape
    out_dtype = values.dtype

    # Fold w_v into W_k once (exact: the reference forward applies no tanh).
    wkv = (W_k.astype(jnp.float32) @ w_v.reshape(-1).astype(jnp.float32)).reshape(1, Dk)

    cd = jnp.dtype(compute_dtype) if compute_dtype is not None else jnp.dtype(keys.dtype)
    k = keys.astype(cd)
    v = values.astype(cd)

    per_query = valid_lens is not None and valid_lens.ndim >= 2
    if valid_lens is None:
        vl = jnp.full((B, 1, 1), K, dtype=jnp.int32)
    elif valid_lens.ndim == 1:
        vl = valid_lens.astype(jnp.int32).reshape(B, 1, 1)
    else:
        vl = valid_lens.astype(jnp.int32).reshape(B, Q, 1)

    cap, cores = _vmem_capacity_and_cores()
    vmem_limit = min(int(cap * 0.75), 100 * 1024 * 1024)   # ~48 MiB on v7x, 96 MiB on v5e/v6e
    budget = int(vmem_limit * 0.7)

    bt, qt = _choose_blocks(B, Q, K, Dk, Dv, cd.itemsize, jnp.dtype(out_dtype).itemsize,
                            per_query, budget, cores)
    if block_b is not None:
        assert B % block_b == 0, "block_b must divide the batch size"
        bt = block_b
    if block_q is not None:
        assert Q % block_q == 0, "block_q must divide the query count"
        qt = block_q

    grid = (B // bt, Q // qt)

    if per_query:
        kernel = functools.partial(_attn_kernel_per_query, approx_recip=approx_recip)
        vl_spec = pl.BlockSpec((bt, qt, 1), lambda b, q: (b, q, 0))
    else:
        kernel = functools.partial(_attn_kernel_per_batch, approx_recip=approx_recip)
        vl_spec = pl.BlockSpec((bt, 1, 1), lambda b, q: (b, 0, 0))

    return pl.pallas_call(
        kernel,
        out_shape=jax.ShapeDtypeStruct((B, Q, Dv), out_dtype),
        grid=grid,
        in_specs=[
            pl.BlockSpec((bt, K, Dk), lambda b, q: (b, 0, 0)),   # keys
            pl.BlockSpec((bt, K, Dv), lambda b, q: (b, 0, 0)),   # values
            vl_spec,                                             # valid lengths
            # Fused weight row: constant block index -> fetched once, reused.
            pl.BlockSpec((1, Dk), lambda b, q: (0, 0)),
        ],
        out_specs=pl.BlockSpec((bt, qt, Dv), lambda b, q: (b, q, 0)),
        compiler_params=pltpu.CompilerParams(
            dimension_semantics=("parallel", "parallel"),
            vmem_limit_bytes=vmem_limit,
        ),
    )(k, v, vl, wkv)


# ----------------------------- pure-JAX reference --------------------------- #

def additive_attention_reference(queries, keys, values, valid_lens, W_q, W_k, w_v):
    """Uncollapsed transliteration of the PyTorch forward (for verification)."""
    B, Q, _ = queries.shape
    K = keys.shape[1]
    qp = queries @ W_q                                        # (B,Q,H)
    kp = keys @ W_k                                           # (B,K,H)
    feats = qp[:, :, None, :] + kp[:, None, :, :]             # (B,Q,K,H)  (no tanh)
    scores = jnp.sum(feats * w_v.reshape(1, 1, 1, -1), axis=-1)   # (B,Q,K)
    if valid_lens is None:
        vl = jnp.full((B, Q), K, dtype=jnp.int32)
    elif valid_lens.ndim == 1:
        vl = jnp.broadcast_to(valid_lens.astype(jnp.int32)[:, None], (B, Q))
    else:
        vl = valid_lens.astype(jnp.int32).reshape(B, Q)
    col = jax.lax.broadcasted_iota(jnp.int32, scores.shape, 2)
    scores = jnp.where(col < vl[:, :, None], scores, -1000000.0)
    attn = jax.nn.softmax(scores, axis=-1)
    return jnp.einsum("bqk,bkd->bqd", attn, values)


# ------------------------------------ demo ---------------------------------- #

if __name__ == "__main__":
    B, Q, K = 2, 4, 8
    query_size, key_size, value_size, num_hiddens = 12, 10, 6, 16

    rng = jax.random.PRNGKey(0)
    kq, kk, kv, kwq, kwk, kwv = jax.random.split(rng, 6)

    queries = jax.random.normal(kq, (B, Q, query_size), dtype=jnp.float32)
    keys    = jax.random.normal(kk, (B, K, key_size),  dtype=jnp.float32)
    values  = jax.random.normal(kv, (B, K, value_size), dtype=jnp.float32)
    valid_lens_1d = jnp.array([3, 6], dtype=jnp.int32)                        # (B,)
    valid_lens_2d = jnp.array([[2, 3, 4, 8], [1, 5, 6, 7]], dtype=jnp.int32)  # (B,Q)

    # torch Linear weights, pre-transposed to (in, out) / (1, H) layouts.
    W_q = 0.1 * jax.random.normal(kwq, (query_size, num_hiddens), dtype=jnp.float32)
    W_k = 0.1 * jax.random.normal(kwk, (key_size,  num_hiddens), dtype=jnp.float32)
    w_v = 0.1 * jax.random.normal(kwv, (1,         num_hiddens), dtype=jnp.float32)

    # --- 1-D valid_lens (common case): Q-collapsed fast path ---
    ref = additive_attention_reference(queries, keys, values, valid_lens_1d, W_q, W_k, w_v)
    out = additive_attention(queries, keys, values, valid_lens_1d, W_q, W_k, w_v,
                             approx_recip=False)
    out = jax.block_until_ready(out)
    assert out.shape == (B, Q, value_size)
    assert jnp.allclose(out, ref, rtol=1e-5, atol=1e-5), "1-D path mismatch vs reference"

    # default approx reciprocal (EUP vrcp) path
    out_fast = additive_attention(queries, keys, values, valid_lens_1d, W_q, W_k, w_v)
    out_fast = jax.block_until_ready(out_fast)
    assert jnp.allclose(out_fast, ref, rtol=5e-3, atol=5e-3), "approx-recip path mismatch"

    # --- 2-D valid_lens (per-query lengths): general path ---
    ref2 = additive_attention_reference(queries, keys, values, valid_lens_2d, W_q, W_k, w_v)
    out2 = additive_attention(queries, keys, values, valid_lens_2d, W_q, W_k, w_v,
                              approx_recip=False)
    out2 = jax.block_until_ready(out2)
    assert jnp.allclose(out2, ref2, rtol=1e-5, atol=1e-5), "2-D path mismatch vs reference"

    # --- valid_lens=None ---
    ref3 = additive_attention_reference(queries, keys, values, None, W_q, W_k, w_v)
    out3 = additive_attention(queries, keys, values, None, W_q, W_k, w_v, approx_recip=False)
    out3 = jax.block_until_ready(out3)
    assert jnp.allclose(out3, ref3, rtol=1e-5, atol=1e-5), "None-lens path mismatch"

    # --- bf16 streaming + bf16 MXU operands (v6e/v7x friendly); softmax stays f32 ---
    out_bf16 = additive_attention(queries, keys, values, valid_lens_1d, W_q, W_k, w_v,
                                  compute_dtype=jnp.bfloat16)
    out_bf16 = jax.block_until_ready(out_bf16)
    assert jnp.allclose(out_bf16.astype(jnp.float32), ref, rtol=1e-1, atol=1e-1), \
        "bf16 compute path mismatch"

    print("KERNEL_OK")
</pallas_src>

<mosaic_0001>
module attributes {stable_mosaic.version = 11 : i64} {
  func.func @_attn_kernel_per_batch(%arg0: i32, %arg1: i32, %arg2: memref<2x8x10xf32, #tpu.memory_space<vmem>>, %arg3: memref<2x8x6xf32, #tpu.memory_space<vmem>>, %arg4: memref<2x1x1xi32, #tpu.memory_space<vmem>>, %arg5: memref<1x10xf32, #tpu.memory_space<vmem>>, %arg6: memref<2x4x6xf32, #tpu.memory_space<vmem>>) attributes {dimension_semantics = [#tpu.dimension_semantics<parallel>, #tpu.dimension_semantics<parallel>], iteration_bounds = array<i64: 1, 1>, scalar_prefetch = 0 : i64, scratch_operands = 0 : i64, tpu.core_type = #tpu.core_type<tc>, window_params = [{transform_indices = @transform_0, window_bounds = array<i64: 2, 8, 10>}, {transform_indices = @transform_1, window_bounds = array<i64: 2, 8, 6>}, {transform_indices = @transform_2, window_bounds = array<i64: 2, 1, 1>}, {pipeline_mode = #tpu.pipeline_mode<synchronous>, transform_indices = @transform_3, window_bounds = array<i64: 1, 10>}, {transform_indices = @transform_4, window_bounds = array<i64: 2, 4, 6>}]} {
    %c0 = arith.constant 0 : index
    %c0_0 = arith.constant 0 : index
    %c0_1 = arith.constant 0 : index
    %0 = vector.load %arg2[%c0, %c0_0, %c0_1] : memref<2x8x10xf32, #tpu.memory_space<vmem>>, vector<2x8x10xf32>
    %c0_2 = arith.constant 0 : index
    %c0_3 = arith.constant 0 : index
    %c0_4 = arith.constant 0 : index
    %1 = vector.load %arg3[%c0_2, %c0_3, %c0_4] : memref<2x8x6xf32, #tpu.memory_space<vmem>>, vector<2x8x6xf32>
    %c0_5 = arith.constant 0 : index
    %c0_6 = arith.constant 0 : index
    %c0_7 = arith.constant 0 : index
    %2 = vector.load %arg4[%c0_5, %c0_6, %c0_7] : memref<2x1x1xi32, #tpu.memory_space<vmem>>, vector<2x1x1xi32>
    %3 = vector.shape_cast %2 : vector<2x1x1xi32> to vector<2x1xi32>
    %c0_8 = arith.constant 0 : index
    %c0_9 = arith.constant 0 : index
    %4 = vector.load %arg5[%c0_8, %c0_9] : memref<1x10xf32, #tpu.memory_space<vmem>>, vector<1x10xf32>
    %5 = vector.shape_cast %4 : vector<1x10xf32> to vector<1x1x10xf32>
    %6 = vector.broadcast %5 : vector<1x1x10xf32> to vector<2x8x10xf32>
    %7 = arith.mulf %0, %6 : vector<2x8x10xf32>
    %cst = arith.constant dense<0.000000e+00> : vector<2x8xf32>
    %8 = vector.multi_reduction <add>, %7, %cst [2] : vector<2x8x10xf32> to vector<2x8xf32>
    %9 = tpu.iota {dimensions = array<i32: 1>} : vector<1x8xi32>
    %10 = vector.broadcast %9 : vector<1x8xi32> to vector<2x8xi32>
    %11 = vector.broadcast %3 : vector<2x1xi32> to vector<2x8xi32>
    %12 = arith.cmpi slt, %10, %11 : vector<2x8xi32>
    %cst_10 = arith.constant -1.000000e+06 : f32
    %13 = vector.broadcast %cst_10 : f32 to vector<2x8xf32>
    %14 = arith.select %12, %8, %13 : vector<2x8xi1>, vector<2x8xf32>
    %cst_11 = arith.constant dense<0xFF800000> : vector<2xf32>
    %15 = vector.multi_reduction <maximumf>, %14, %cst_11 [1] : vector<2x8xf32> to vector<2xf32>
    %16 = vector.shape_cast %15 : vector<2xf32> to vector<2x1xf32>
    %17 = vector.broadcast %16 : vector<2x1xf32> to vector<2x8xf32>
    %18 = arith.subf %14, %17 : vector<2x8xf32>
    %19 = math.exp %18 : vector<2x8xf32>
    %cst_12 = arith.constant dense<0.000000e+00> : vector<2xf32>
    %20 = vector.multi_reduction <add>, %19, %cst_12 [1] : vector<2x8xf32> to vector<2xf32>
    %21 = vector.shape_cast %20 : vector<2xf32> to vector<2x1xf32>
    %22 = tpu.reciprocal %21 : vector<2x1xf32> -> vector<2x1xf32>
    %23 = vector.broadcast %22 : vector<2x1xf32> to vector<2x8xf32>
    %24 = arith.mulf %19, %23 : vector<2x8xf32>
    %25 = vector.shape_cast %24 : vector<2x8xf32> to vector<2x1x8xf32>
    "tpu.trace_start"() <{level = 10 : i32, message = "bqk,bkd->bqd"}> : () -> ()
    %cst_13 = arith.constant dense<0.000000e+00> : vector<2x1x6xf32>
    %26 = tpu.matmul %25, %1, %cst_13 {dimension_numbers = #tpu.dot_dimension_numbers<[2], [1], [1], [2], [0, 0, 0, 1, 1, 2], [0], [0]>} : vector<2x1x8xf32>, vector<2x8x6xf32>, vector<2x1x6xf32> -> vector<2x1x6xf32>
    "tpu.trace_stop"() : () -> ()
    %27 = vector.shape_cast %26 : vector<2x1x6xf32> to vector<2x1x6xf32>
    %28 = vector.broadcast %27 : vector<2x1x6xf32> to vector<2x4x6xf32>
    %c0_14 = arith.constant 0 : index
    %c0_15 = arith.constant 0 : index
    %c0_16 = arith.constant 0 : index
    %29 = vector.load %arg6[%c0_14, %c0_15, %c0_16] : memref<2x4x6xf32, #tpu.memory_space<vmem>>, vector<2x4x6xf32>
    tpu.vector_store %arg6[%c0_14, %c0_15, %c0_16], %28 {strides = array<i32>} : memref<2x4x6xf32, #tpu.memory_space<vmem>>, vector<2x4x6xf32>,
    return
  }
  func.func @transform_0(%arg0: i32, %arg1: i32) -> (i32, i32, i32) {
    %c0_i32 = arith.constant 0 : i32
    %c0_i32_0 = arith.constant 0 : i32
    %c0_i32_1 = arith.constant 0 : i32
    return %arg0, %c0_i32, %c0_i32_0 : i32, i32, i32
  }
  func.func @transform_1(%arg0: i32, %arg1: i32) -> (i32, i32, i32) {
    %c0_i32 = arith.constant 0 : i32
    %c0_i32_0 = arith.constant 0 : i32
    %c0_i32_1 = arith.constant 0 : i32
    return %arg0, %c0_i32, %c0_i32_0 : i32, i32, i32
  }
  func.func @transform_2(%arg0: i32, %arg1: i32) -> (i32, i32, i32) {
    %c0_i32 = arith.constant 0 : i32
    %c0_i32_0 = arith.constant 0 : i32
    %c0_i32_1 = arith.constant 0 : i32
    return %arg0, %c0_i32, %c0_i32_0 : i32, i32, i32
  }
  func.func @transform_3(%arg0: i32, %arg1: i32) -> (i32, i32) {
    %c0_i32 = arith.constant 0 : i32
    %c0_i32_0 = arith.constant 0 : i32
    %c0_i32_1 = arith.constant 0 : i32
    return %c0_i32, %c0_i32_0 : i32, i32
  }
  func.func @transform_4(%arg0: i32, %arg1: i32) -> (i32, i32, i32) {
    %c0_i32 = arith.constant 0 : i32
    %c0_i32_0 = arith.constant 0 : i32
    return %arg0, %arg1, %c0_i32 : i32, i32, i32
  }
}

</mosaic_0001>

<bundles_post_ra>
// kernel: tpu_custom_call.1
= control target key start
LH: loop header
LB: loop body
LE: loop exit
PB: predicated region body
PF: predicated region fallthrough
CT: control target
= control target key end

     0   :  { %vm33_vm0 = vcmask 80896   ;;  %v347_v4 = vmov 0   ;;  %s418_s0 = inlined_call_operand.vmem [shape: f32[2,8,10], index: 0, kind: input, shape index: {}]   ;;  %s419_s1 = inlined_call_operand.vmem [shape: f32[2,8,6], index: 1, kind: input, shape index: {}]   ;;  %s420_s2 = inlined_call_operand.vmem [shape: s32[2,1,1], index: 2, kind: input, shape index: {}]   ;;  %s421_s3 = inlined_call_operand.vmem [shape: f32[1,10], index: 3, kind: input, shape index: {}]   ;;  %s422_s4 = inlined_call_operand.hbm [shape: f32[2,4,6], index: 4, kind: output, shape index: {}]  }
   0x1   :  { %v18_v0 = vld [vmem:[%s418_s0] sm:$0xff]  ;;  %v19_v2 = vld [vmem:[%s418_s0 + $0x8] sm:$0xff]  ;;  %317 = vset.pattern.permute.xlu1 %v347_v4  ;;  %318 = vset.pattern.permute.xlu0 %v347_v4 }
   0x2   :  { %v293_v1 = vld [vmem:[%s421_s3] ss:$0 sm:$0xff] }
   0x3   :  { %v31_v3 = vmul.f32 %v293_v1, %v18_v0  ;;  %v22_v5 = vld [vmem:[%s420_s2] sm:$0x1]  ;;  %v32_v6 = vmul.f32 %v293_v1, %v19_v2 }
   0x4   :  { %9 = vsyncpa [#allocation3], 0  ;;  %43 = vperm.xlu1 %317, %v22_v5   ;;  %v23_v8 = vld [vmem:[%s420_s2 + $0x1] sm:$0x1]  ;;  %v40_v10 = vlaneseq  ;;  %v348_v14 = vmov 1966171168  }
   0x5   :  { %v34_v7 = vsel %vm33_vm0, %v31_v3, 0.0  ;;  %v37_v9 = vsel %vm33_vm0, %v32_v6, 0.0  ;;  %v58_v15 = vunpack.c.l.s4 %v348_v14  ;;  %vm82_vm1 = vcmask 1041409   ;;  %v20_v38 = vld [vmem:[%s419_s1] sm:$0xff]  ;;  %v21_v40 = vld [vmem:[%s419_s1 + $0x8] sm:$0xff]  ;;  %s351_s26 = smov [#allocation2]  }
   0x6   :  { %35 = vadd.xlane.f32.xlu0 %v34_v7  ;;  %v46_v11 = vshrl.u32 %v40_v10, 7  ;;  %v41_v22 = vand.u32 127, %v40_v10  ;;  %vm86_vm2 = vcmask 58368   ;;  %v349_v39 = vmov 0.0   ;;  %s282_s27 = sshll.u32 %s351_s26, 4  ;;  %s283_s27 = int_to_ptr.vmem [resolvable:$true] %s282_s27 }
   0x7   :  { %v59_v18 = vunpack.c.0.s8 %v58_v15  ;;  %300 = vmatprep.subr.mxu0 %v349_v39  ;;  %vm350_vm4 = vmmov 0   ;;  %305 = vmatprep.subr.mxu1 %v349_v39  ;;  %vm121_vm5 = vcmask 64512   ;;  %vm274_vm6 = vcmask 44032   ;;  %s323_s1 = scalar_lea.vmem %s283_s27, 128  ;;  %p328_p1 = scmp.lt.s32.totalorder %s283_s27, %s283_s27 }
   0x8   :  { %50 = vperm.xlu1 %317, %v23_v8   ;;  %v394_v13 = vsub.s32 0, %v46_v11  ;;  %v76_v25 = vsub.s32 %v41_v22, %v46_v11  ;;  %302 = vmatprep.mubr.msk.f32.mxu0 %vm350_vm4, %v349_v39  ;;  %p324_p0 = scmp.ne.s32.totalorder %s283_s27, %s323_s1  ;;  %p329_p2 = scmp.lt.s32.totalorder %s323_s1, %s323_s1 }
   0x9   :  { %v62_v20 = vsub.s32 %v59_v18, %v46_v11  ;;  %301 = vmatpush3.msra.mxu0 %v20_v38  ;;  %307 = vmatprep.mubr.msk.f32.mxu1 %vm350_vm4, %v349_v39 }
   0xa   :  { %38 = vadd.xlane.f32.xlu0 %v37_v9  ;;  %306 = vmatpush3.msra.mxu1 %v21_v40  ;;  %p330_p3 = por %p329_p2, %p328_p1 }
   0xc   :  { %p331_p4 = pnand %p330_p3, %p324_p0 }
  0x83   :  { %v44_v12 = vpop.permute.xlu1 %43 }
  0x84   :  { %v48_v17 = vrot.slane %v44_v12, %v394_v13 }
  0x87   :  { %v51_v16 = vpop.permute.xlu1 %50 }
  0x88   :  { %v55_v19 = vrot.slane %v51_v16, %v394_v13 }
  0x8a   :  { %v56_v21 = vcombine.low %v48_v17, %v55_v19 }
  0x8c   :  { %v63_v23 = vrot.slane %v56_v21, %v62_v20 }
  0x8e   :  { %v70_v26 = vrot.slane %v63_v23, %v62_v20 }
  0x90   :  { %vm71_vm3 = vcmp.lt.s32.totalorder %v41_v22, %v70_v26 }
  0x93   :  { %v36_v24 = vpop.xlane.xlu0 %35 }
  0x94   :  { %v77_v28 = vrot.slane %v36_v24, %v76_v25 }
  0x97   :  { %v39_v27 = vpop.xlane.xlu0 %38 }
  0x98   :  { %v81_v29 = vrot.slane %v39_v27, %v76_v25 }
  0x9a   :  { %v83_v30 = vsel %vm82_vm1, %v81_v29, %v77_v28 }
  0x9b   :  { %v85_v31 = vsel %vm71_vm3, %v83_v30, -1000000.0 }
  0x9c   :  { %v87_v32 = vsel %vm86_vm2, %v85_v31, -inf }
  0x9d   :  { %88 = vmax.xlane.f32.xlu0 %v87_v32 }
 0x12a   :  { %v89_v33 = vpop.xlane.xlu0 %88 }
 0x12b   :  { %v90_v34 = vsub.f32 %v85_v31, %v89_v33 }
 0x12d   :  { %v91_v35 = vmul.f32 1.442695, %v90_v34 }
 0x12f   :  { %319 = vpow2.f32 %v91_v35 }
 0x139   :  { %v320_v36 = vpop.eup %319 }
 0x13a   :  { %v93_v37 = vsel %vm86_vm2, %v320_v36, 0.0 }
 0x13b   :  { %94 = vadd.xlane.f32.xlu1 %v93_v37 }
 0x1c8   :  { %v95_v41 = vpop.xlane.xlu1 %94 }
 0x1c9   :  { %321 = vrcp.f32 %v95_v41 }
 0x1d3   :  { %v322_v42 = vpop.eup %321 }
 0x1d4   :  { %v97_v43 = vmul.f32 %v322_v42, %v320_v36 }
 0x1d6   :  { %v105_v44 = vrot.slane %v97_v43, %v62_v20 }
 0x1d8   :  { %v113_v45 = vrot.slane %v105_v44, %v62_v20  ;;  %v106_v46 = vcombine.high %v105_v44, %v105_v44 }
 0x1da   :  { %303 = vmatmul.mubr.msk.f32.vlgmr.msra.gmra.mrb[0].mxu0 %vm121_vm5, %v113_v45  ;;  %v120_v47 = vrot.slane %v106_v46, %v62_v20 }
 0x1dc   :  { %308 = vmatmul.mubr.msk.f32.vlgmr.msra.gmra.mrb[0].mxu1 %vm121_vm5, %v120_v47 }
 0x2ad   :  { %v190_v48 = vpop.f32.mrb[0].mxu0 }
 0x2ae   :  { %v269_v49 = vrot.slane %v190_v48, %v394_v13  ;;  %v304_v50 = vpop.f32.mrb[1].mxu0 }
 0x2af   :  { %v262_v51 = vpop.f32.mrb[0].mxu1 }
 0x2b0   :  { %275 = vst.msk [vmem:[#allocation2] sm:$0xf] %vm274_vm6, %v269_v49  ;;  %v273_v52 = vrot.slane %v262_v51, %v394_v13  ;;  %v309_v53 = vpop.f32.mrb[1].mxu1 }
 0x2b2   :  { %276 = vst.msk [vmem:[#allocation2 + $0x4] sm:$0xf] %vm274_vm6, %v273_v52 }
 0x2b3   :  { %334 = shalt.err (!%p331_p4)
}
 0x2b4   :  { %s335_s30 = scalar_lea.hbm %s422_s4, 128 }
 0x2b5   :  { %p336_p5 = scmp.ne.s32.totalorder %s422_s4, %s335_s30  ;;  %p339_p6 = scmp.lt.u32.totalorder %s335_s30, %s422_s4 }
 0x2b7   :  { %p341_p7 = pnand %p339_p6, %p336_p5 }
 0x2b9   :  { %344 = shalt.err (!%p341_p7)
}
 0x2ba   :  { %s352_s9 = smov 64   ;;  %s353_s10 = smov 4  }
 0x2bb   :  { %288 = dma.vmem_to_hbm [thread:$0]  %s283_s27, 128, %s422_s4, [#allocation3], %s352_s9, %s352_s9, %s353_s10  }
 0x2bc   :  { %345 = dma.done.wait [#allocation3], 128  }
 0x2bd   :  { %346 = vsyncadd [#allocation3], 4294967168 }
 0x2be   :  { %292 = vsyncpa [#allocation3], 1 }

</bundles_post_ra>
